<compile_context>
chip_gen: v7x
topology: tpu7x:2x2x1
jax: 0.10.0
libtpu: 0.0.40
codegen_flags: <defaults>
</compile_context>

<pallas_src>
import jax
import jax.numpy as jnp
from jax.experimental import pallas as pl
from jax.experimental.pallas import tpu as pltpu


def global_norm_kernel(x_ref, o_ref):
    x = x_ref[...].astype(jnp.float32)               # (h, TL)
    h = x.shape[0]
    mean = jnp.mean(x, axis=0, keepdims=True)        # (1, TL) sublane reduce (XLU)
    diff = x - mean
    # torch.var default is unbiased (divide by h - 1).
    # NOTE: h == 1 yields the same NaN torch.var produces (0/0) — not guarded.
    var = jnp.sum(diff * diff, axis=0, keepdims=True) / jnp.float32(h - 1)
    inv_std = jax.lax.rsqrt(var + jnp.float32(1e-5))  # EUP
    o_ref[...] = (diff * inv_std).astype(o_ref.dtype)


def _choose_tile_l(h, l, itemsize):
    """Biggest lane-dense (multiple-of-128) column-tile width that fits VMEM."""
    # 2 pipeline buffers x (input tile + output tile) x h rows; count each
    # element conservatively at >= 4 B.  Keep the working set <= ~24 MiB so
    # double-buffering survives v7x's 64 MiB VMEM with headroom for the
    # compiler's own scratch.
    budget = 24 * 1024 * 1024
    per_col_bytes = 4 * h * max(int(itemsize), 4)
    fit_cols = max(1, budget // per_col_bytes)
    l128 = ((l + 127) // 128) * 128
    tl = (min(fit_cols, 4096, l128) // 128) * 128
    return max(128, tl)


def global_norm(data, tile_l=None):
    h, l = data.shape
    tl = tile_l if tile_l is not None else _choose_tile_l(h, l, data.dtype.itemsize)
    n_blocks = pl.cdiv(l, tl)
    l_pad = n_blocks * tl
    x = data if l_pad == l else jnp.pad(data, ((0, 0), (0, l_pad - l)))

    # TODO(synk): if h ever grows so large that an (h, 128) slab exceeds the
    # VMEM budget (h >~ 1.2e4 rows at f32), switch to a two-kernel scheme:
    # (1) h-tiled sum/sumsq accumulation producing per-column mean/inv_std,
    # (2) an h- and l-tiled normalize pass.

    tile_vmem = 4 * h * tl * max(int(data.dtype.itemsize), 4)  # 2 bufs * (in + out)
    vmem_limit = int(min(48 * 1024 * 1024,
                         max(16 * 1024 * 1024, tile_vmem + (4 << 20))))

    out = pl.pallas_call(
        global_norm_kernel,
        out_shape=jax.ShapeDtypeStruct((h, l_pad), data.dtype),
        grid=(n_blocks,),
        in_specs=[pl.BlockSpec((h, tl), lambda j: (0, j))],
        out_specs=pl.BlockSpec((h, tl), lambda j: (0, j)),
        compiler_params=pltpu.CompilerParams(
            dimension_semantics=("parallel",),
            vmem_limit_bytes=vmem_limit),
    )(x)

    return out if l_pad == l else out[:, :l]


def _reference(data):
    mean_ = jnp.mean(data, axis=0)
    var_ = jnp.var(data, axis=0, ddof=1)   # unbiased, like torch.var
    return (data - mean_) / jnp.sqrt(var_ + 1e-5)


if __name__ == "__main__":
    key = jax.random.PRNGKey(0)

    # case 1: shape implied by the module (narrow l -> padded to one 128-lane tile)
    h, l = 16, 32
    data = jax.random.normal(key, (h, l), dtype=jnp.float32)
    out = global_norm(data)
    jax.block_until_ready(out)
    assert out.shape == (h, l)
    assert jnp.allclose(out, _reference(data), atol=1e-5, rtol=1e-5), "mismatch (16,32)"

    # case 2: exercises pad/slice with an auto-chosen (single, lane-dense) tile
    h2, l2 = 16, 1000
    data2 = jax.random.normal(jax.random.PRNGKey(0), (h2, l2), dtype=jnp.float32)
    out2 = global_norm(data2)
    jax.block_until_ready(out2)
    assert out2.shape == (h2, l2)
    assert jnp.allclose(out2, _reference(data2), atol=1e-5, rtol=1e-5), "mismatch (16,1000)"

    # case 3: force a small tile to exercise the multi-block pipelined path
    out3 = global_norm(data2, tile_l=256)
    jax.block_until_ready(out3)
    assert out3.shape == (h2, l2)
    assert jnp.allclose(out3, _reference(data2), atol=1e-5, rtol=1e-5), "mismatch multi-tile"

    print("KERNEL_OK")
</pallas_src>

<mosaic_0001>
module attributes {stable_mosaic.version = 11 : i64} {
  func.func @global_norm_kernel(%arg0: i32, %arg1: memref<16x128xf32, #tpu.memory_space<vmem>>, %arg2: memref<16x128xf32, #tpu.memory_space<vmem>>) attributes {dimension_semantics = [#tpu.dimension_semantics<parallel>], iteration_bounds = array<i64: 1>, scalar_prefetch = 0 : i64, scratch_operands = 0 : i64, tpu.core_type = #tpu.core_type<tc>, window_params = [{transform_indices = @transform_0, window_bounds = array<i64: 16, 128>}, {transform_indices = @transform_1, window_bounds = array<i64: 16, 128>}]} {
    %c0 = arith.constant 0 : index
    %c0_0 = arith.constant 0 : index
    %0 = vector.load %arg1[%c0, %c0_0] : memref<16x128xf32, #tpu.memory_space<vmem>>, vector<16x128xf32>
    %cst = arith.constant dense<0.000000e+00> : vector<128xf32>
    %1 = vector.multi_reduction <add>, %0, %cst [0] : vector<16x128xf32> to vector<128xf32>
    %2 = vector.shape_cast %1 : vector<128xf32> to vector<1x128xf32>
    %cst_1 = arith.constant 1.600000e+01 : f32
    %3 = vector.broadcast %cst_1 : f32 to vector<1x128xf32>
    %4 = arith.divf %2, %3 : vector<1x128xf32>
    %5 = vector.broadcast %4 : vector<1x128xf32> to vector<16x128xf32>
    %6 = arith.subf %0, %5 : vector<16x128xf32>
    %7 = arith.mulf %6, %6 : vector<16x128xf32>
    %cst_2 = arith.constant dense<0.000000e+00> : vector<128xf32>
    %8 = vector.multi_reduction <add>, %7, %cst_2 [0] : vector<16x128xf32> to vector<128xf32>
    %9 = vector.shape_cast %8 : vector<128xf32> to vector<1x128xf32>
    %cst_3 = arith.constant 1.500000e+01 : f32
    %10 = vector.broadcast %cst_3 : f32 to vector<1x128xf32>
    %11 = arith.divf %9, %10 : vector<1x128xf32>
    %cst_4 = arith.constant 9.99999974E-6 : f32
    %12 = vector.broadcast %cst_4 : f32 to vector<1x128xf32>
    %13 = arith.addf %11, %12 : vector<1x128xf32>
    %14 = math.rsqrt %13 : vector<1x128xf32>
    %15 = vector.broadcast %14 : vector<1x128xf32> to vector<16x128xf32>
    %16 = arith.mulf %6, %15 : vector<16x128xf32>
    %c0_5 = arith.constant 0 : index
    %c0_6 = arith.constant 0 : index
    %17 = vector.load %arg2[%c0_5, %c0_6] : memref<16x128xf32, #tpu.memory_space<vmem>>, vector<16x128xf32>
    tpu.vector_store %arg2[%c0_5, %c0_6], %16 {strides = array<i32>} : memref<16x128xf32, #tpu.memory_space<vmem>>, vector<16x128xf32>,
    return
  }
  func.func @transform_0(%arg0: i32) -> (i32, i32) {
    %c0_i32 = arith.constant 0 : i32
    %c0_i32_0 = arith.constant 0 : i32
    return %c0_i32, %arg0 : i32, i32
  }
  func.func @transform_1(%arg0: i32) -> (i32, i32) {
    %c0_i32 = arith.constant 0 : i32
    %c0_i32_0 = arith.constant 0 : i32
    return %c0_i32, %arg0 : i32, i32
  }
}

</mosaic_0001>

<bundles_post_ra>
// kernel: tpu_custom_call.1
= control target key start
LH: loop header
LB: loop body
LE: loop exit
PB: predicated region body
PF: predicated region fallthrough
CT: control target
= control target key end

     0   :  { %6 = vsyncpa [#allocation3], 0  ;;  %s168_s0 = inlined_call_operand.hbm [shape: f32[16,128], index: 0, kind: input, shape index: {}]   ;;  %s169_s1 = inlined_call_operand.hbm [shape: f32[16,128], index: 1, kind: output, shape index: {}]  }
   0x1   :  { %7 = vsyncpa [#allocation4], 0  ;;  %s124_s6 = smov [#allocation2]   ;;  %s76_s10 = scalar_lea.hbm %s168_s0, 256 }
   0x2   :  { %s13_s7 = sshll.u32 %s124_s6, 4  ;;  %p77_p0 = scmp.ne.s32.totalorder %s168_s0, %s76_s10  ;;  %s14_s7 = int_to_ptr.vmem [resolvable:$true] %s13_s7 }
   0x3   :  { %p80_p1 = scmp.lt.u32.totalorder %s76_s10, %s168_s0 }
   0x5   :  { %p82_p2 = pnand %p80_p1, %p77_p0 }
   0x7   :  { %85 = shalt.err (!%p82_p2)
}
   0x8   :  { %s86_s15 = scalar_lea.vmem %s14_s7, 256  ;;  %p91_p4 = scmp.lt.s32.totalorder %s14_s7, %s14_s7 }
   0x9   :  { %p87_p3 = scmp.ne.s32.totalorder %s14_s7, %s86_s15  ;;  %p92_p5 = scmp.lt.s32.totalorder %s86_s15, %s86_s15 }
   0xb   :  { %p93_p6 = por %p92_p5, %p91_p4 }
   0xd   :  { %p94_p7 = pnand %p93_p6, %p87_p3 }
   0xf   :  { %97 = shalt.err (!%p94_p7)
}
  0x10   :  { %s125_s16 = smov 128   ;;  %s126_s17 = smov 8  }
  0x11   :  { %19 = dma.hbm_to_vmem [thread:$0]  %s168_s0, 256, %s14_s7, [#allocation3], %s125_s16, %s125_s16, %s126_s17  }
  0x12   :  { %120 = dma.done.wait [#allocation3], 256  }
  0x13   :  { %121 = vsyncadd [#allocation3], 4294967040  ;;  %v23_v0 = vld [vmem:[#allocation2] sm:$0xff]  ;;  %v24_v1 = vld [vmem:[#allocation2 + $0x8] sm:$0xff]  ;;  %s127_s0 = smov [#allocation5]  }
  0x14   :  { %v25_v2 = vadd.f32 %v24_v1, %v23_v0  ;;  %s58_s20 = sshll.u32 %s127_s0, 4  ;;  %s59_s20 = int_to_ptr.vmem [resolvable:$true] %s58_s20 }
  0x15   :  { %s98_s21 = scalar_lea.vmem %s59_s20, 256  ;;  %p103_p9 = scmp.lt.s32.totalorder %s59_s20, %s59_s20 }
  0x16   :  { %v26_v3 = vrot.slane %v25_v2, 4  ;;  %p99_p8 = scmp.ne.s32.totalorder %s59_s20, %s98_s21  ;;  %p104_p10 = scmp.lt.s32.totalorder %s98_s21, %s98_s21 }
  0x18   :  { %v27_v4 = vadd.f32 %v26_v3, %v25_v2  ;;  %p105_p11 = por %p104_p10, %p103_p9 }
  0x1a   :  { %v28_v5 = vrot.slane %v27_v4, 2  ;;  %p106_p12 = pnand %p105_p11, %p99_p8 }
  0x1c   :  { %v29_v6 = vadd.f32 %v28_v5, %v27_v4 }
  0x1e   :  { %v30_v7 = vrot.slane %v29_v6, 1 }
  0x20   :  { %v31_v8 = vadd.f32 %v30_v7, %v29_v6 }
  0x22   :  { %v33_v9 = vmul.f32 0.0625, %v31_v8 }
  0x24   :  { %v34_v10 = vsub.f32 %v23_v0, %v33_v9  ;;  %v35_v11 = vsub.f32 %v24_v1, %v33_v9 }
  0x26   :  { %v36_v12 = vmul.f32 %v34_v10, %v34_v10  ;;  %v37_v13 = vmul.f32 %v35_v11, %v35_v11 }
  0x28   :  { %v38_v14 = vadd.f32 %v37_v13, %v36_v12 }
  0x2a   :  { %v39_v15 = vrot.slane %v38_v14, 4 }
  0x2c   :  { %v40_v16 = vadd.f32 %v39_v15, %v38_v14 }
  0x2e   :  { %v41_v17 = vrot.slane %v40_v16, 2 }
  0x30   :  { %v42_v18 = vadd.f32 %v41_v17, %v40_v16 }
  0x32   :  { %v43_v19 = vrot.slane %v42_v18, 1 }
  0x34   :  { %v44_v20 = vadd.f32 %v43_v19, %v42_v18 }
  0x36   :  { %v46_v21 = vmul.f32 0.06666667, %v44_v20 }
  0x38   :  { %v47_v22 = vadd.f32 1e-05, %v46_v21 }
  0x3a   :  { %74 = vrsqrt.f32 %v47_v22 }
  0x44   :  { %v75_v23 = vpop.eup %74 }
  0x45   :  { %v49_v24 = vmul.f32 %v75_v23, %v34_v10  ;;  %v50_v25 = vmul.f32 %v75_v23, %v35_v11 }
  0x47   :  { %51 = vst [vmem:[#allocation5] sm:$0xff] %v49_v24  ;;  %52 = vst [vmem:[#allocation5 + $0x8] sm:$0xff] %v50_v25 }
  0x48   :  { %109 = shalt.err (!%p106_p12)
}
  0x49   :  { %s110_s24 = scalar_lea.hbm %s169_s1, 256 }
  0x4a   :  { %p111_p13 = scmp.ne.s32.totalorder %s169_s1, %s110_s24  ;;  %p114_p0 = scmp.lt.u32.totalorder %s110_s24, %s169_s1 }
  0x4c   :  { %p116_p1 = pnand %p114_p0, %p111_p13 }
  0x4e   :  { %119 = shalt.err (!%p116_p1)
}
  0x4f   :  { %64 = dma.vmem_to_hbm [thread:$0]  %s59_s20, 256, %s169_s1, [#allocation4], %s125_s16, %s125_s16, %s126_s17  }
  0x50   :  { %122 = dma.done.wait [#allocation4], 256  }
  0x51   :  { %123 = vsyncadd [#allocation4], 4294967040 }
  0x52   :  { %68 = vsyncpa [#allocation3], 1 }
  0x53   :  { %69 = vsyncpa [#allocation4], 1 }

</bundles_post_ra>
